<compile_context>
chip_gen: v7x
topology: tpu7x:2x2x1
jax: 0.10.0
libtpu: 0.0.40
codegen_flags: <defaults>
</compile_context>

<pallas_src>
import functools

import jax
import jax.numpy as jnp
from jax.experimental import pallas as pl
from jax.experimental.pallas import tpu as pltpu

LANE = 128


def _round_up(x, m):
    return (x + m - 1) // m * m


def _pad2d(x, rows, cols):
    r, c = x.shape
    return jnp.pad(x, ((0, rows - r), (0, cols - c)))


@functools.lru_cache(maxsize=None)
def _vmem_limit_bytes():
    # Generation-aware scoped-VMEM budget: ~5/8 of physical capacity,
    # conservative 40 MiB fallback (safe even on v7x's 64 MiB VMEM).
    try:
        cap = int(pltpu.get_tpu_info().vmem_capacity_bytes)
    except Exception:
        return 40 * 1024 * 1024
    return max(32 * 1024 * 1024, min(100 * 1024 * 1024, (cap * 5) // 8))


def _compiler_params(dims):
    return pltpu.CompilerParams(dimension_semantics=dims,
                                vmem_limit_bytes=_vmem_limit_bytes())


def _row_tiling(M, tm_max=512):
    """Row tile for the 1x1-conv kernels.  Prefer a multiple of 8 that divides
    M exactly (no jnp.pad HBM pass); fall back to padding only for awkward M."""
    if M <= tm_max:
        tm = _round_up(M, 8)
        return tm, tm
    top = tm_max - tm_max % 8
    for tm in range(top, 7, -8):
        if M % tm == 0 and tm >= 64:
            return tm, M
    return top, _round_up(M, top)


def _pick_rh(Ho, Wo, target_rows=1024):
    """Output H-rows per conv2 grid step: largest divisor of Ho with rh*Wo<=target."""
    cap = max(1, target_rows // max(Wo, 1))
    best = 1
    for d in range(1, Ho + 1):
        if Ho % d == 0 and d <= cap:
            best = d
    return best


# ----------------------------------------------------------------------------
# Pallas kernels
# ----------------------------------------------------------------------------
def _matmul_bn_kernel(x_ref, w_ref, shift_ref, o_ref, *, relu):
    """out = maybe_relu(x @ w_folded + shift) — 1x1 conv + BN (scale pre-folded)."""
    acc = jnp.dot(x_ref[...], w_ref[...], preferred_element_type=jnp.float32)
    y = acc + shift_ref[...]
    if relu:
        y = jnp.maximum(y, 0.0)
    o_ref[...] = y.astype(o_ref.dtype)


def _conv3x3_s1_kernel(x_ref, w_ref, shift_ref, o_ref, *, rh, Wo):
    """3x3 conv (pad=1, stride=1) + BN + ReLU for one (image, row-chunk).

    x_ref     : (1, Hp, Wp, Cin)  whole zero-padded image; index map is constant
                along the row-chunk axis so it is DMA'd once per image and kept
                VMEM-resident across chunks.
    w_ref     : (3, 3, Cin, Cout) per-tap weights (BN scale folded).
    shift_ref : (1, Cout)
    o_ref     : (1, rh, Wo, Cout)
    """
    cin = x_ref.shape[-1]
    cout = o_ref.shape[-1]
    h0 = pl.program_id(1) * rh
    if rh % 8 == 0:
        h0 = pl.multiple_of(h0, 8)
    # (rh+2, Wp, Cin) window for this chunk — one dynamic load from the
    # resident image; all 9 tap slabs are static slices of it (no im2col).
    win = x_ref[0, pl.ds(h0, rh + 2), :, :]
    shift = shift_ref[...]
    acc = None
    for kh in range(3):
        for kw in range(3):
            slab = win[kh:kh + rh, kw:kw + Wo, :].reshape(rh * Wo, cin)
            part = jnp.dot(slab, w_ref[kh, kw],
                           preferred_element_type=jnp.float32)
            acc = part if acc is None else acc + part
    y = jnp.maximum(acc + shift, 0.0)
    o_ref[0] = y.reshape(rh, Wo, cout).astype(o_ref.dtype)


def _conv3x3_strided_kernel(x_ref, w_ref, shift_ref, o_ref, *,
                            stride, Wo, row_chunk):
    """3x3 conv (pad=1, stride>1) + BN + ReLU for one image, kw folded into K.

    x_ref : (1, stride, Hph*Wo, 3*Cin)  H-phase-split, W-taps folded in channels
    w_ref : (3, 3*Cin, Cout)            per-kh weight matrices (BN scale folded)
    o_ref : (1, Ho*Wo, Cout)
    """
    M = o_ref.shape[1]
    shift = shift_ref[...]
    for r0 in range(0, M, row_chunk):      # realistic stride-2 shapes: 1 chunk
        rows = min(row_chunk, M - r0)
        acc = None
        for kh in range(3):
            phase = kh % stride
            base = (kh // stride) * Wo + r0          # static Python int
            slab = x_ref[0, phase, base:base + rows, :]
            part = jnp.dot(slab, w_ref[kh], preferred_element_type=jnp.float32)
            acc = part if acc is None else acc + part
        y = jnp.maximum(acc + shift, 0.0)
        o_ref[0, r0:r0 + rows, :] = y.astype(o_ref.dtype)


def _final_proj_kernel(h_ref, w3_ref, b3_ref, xs_ref, ws_ref, bs_ref, o_ref):
    """out = relu((h @ w3 + b3) + (xs @ ws + bs)) — projection shortcut."""
    main = jnp.dot(h_ref[...], w3_ref[...],
                   preferred_element_type=jnp.float32) + b3_ref[...]
    short = jnp.dot(xs_ref[...], ws_ref[...],
                    preferred_element_type=jnp.float32) + bs_ref[...]
    o_ref[...] = jnp.maximum(main + short, 0.0).astype(o_ref.dtype)


def _final_identity_kernel(h_ref, w3_ref, b3_ref, xs_ref, o_ref):
    """out = relu((h @ w3 + b3) + x) — identity shortcut."""
    main = jnp.dot(h_ref[...], w3_ref[...],
                   preferred_element_type=jnp.float32) + b3_ref[...]
    o_ref[...] = jnp.maximum(main + xs_ref[...].astype(jnp.float32),
                             0.0).astype(o_ref.dtype)


# ----------------------------------------------------------------------------
# pallas_call wrappers
# ----------------------------------------------------------------------------
def matmul_bn(x2d, w, shift, *, relu, out_dtype, tm_max=512):
    """Row-tiled fused matmul + shift (+relu). x2d/w already lane-padded, bf16."""
    M, K = x2d.shape
    Nc = w.shape[1]
    tm, Mp = _row_tiling(M, tm_max)
    if Mp != M:                         # rare fallback (awkward M only)
        x2d = jnp.pad(x2d, ((0, Mp - M), (0, 0)))
    out = pl.pallas_call(
        functools.partial(_matmul_bn_kernel, relu=relu),
        out_shape=jax.ShapeDtypeStruct((Mp, Nc), out_dtype),
        grid=(Mp // tm,),
        in_specs=[
            pl.BlockSpec((tm, K), lambda i: (i, 0)),
            pl.BlockSpec((K, Nc), lambda i: (0, 0)),
            pl.BlockSpec((1, Nc), lambda i: (0, 0)),
        ],
        out_specs=pl.BlockSpec((tm, Nc), lambda i: (i, 0)),
        compiler_params=_compiler_params(("parallel",)),
    )(x2d, w, shift.reshape(1, Nc))
    return out if Mp == M else out[:M]


def conv3x3_bn_relu(h1_nhwc, w2, shift, *, stride):
    """Fused 3x3 conv (pad=1, stride) + BN + ReLU.

    h1_nhwc : (N, H, W, Cp) bf16, lane-padded.  w2: (3, 3, Cp, Cout) bf16.
    Returns ((N*Ho*Wo, Cout) bf16, Ho, Wo).
    """
    N, H, W, Cp = h1_nhwc.shape
    Cout = w2.shape[-1]

    if stride == 1:
        Ho, Wo = H, W
        hp = jnp.pad(h1_nhwc, ((0, 0), (1, 1), (1, 1), (0, 0)))  # (N,H+2,W+2,Cp)
        rh = _pick_rh(Ho, Wo)
        out = pl.pallas_call(
            functools.partial(_conv3x3_s1_kernel, rh=rh, Wo=Wo),
            out_shape=jax.ShapeDtypeStruct((N, Ho, Wo, Cout), jnp.bfloat16),
            grid=(N, Ho // rh),
            in_specs=[
                pl.BlockSpec((1, H + 2, W + 2, Cp), lambda n, j: (n, 0, 0, 0)),
                pl.BlockSpec((3, 3, Cp, Cout), lambda n, j: (0, 0, 0, 0)),
                pl.BlockSpec((1, Cout), lambda n, j: (0, 0)),
            ],
            out_specs=pl.BlockSpec((1, rh, Wo, Cout), lambda n, j: (n, j, 0, 0)),
            compiler_params=_compiler_params(("parallel", "parallel")),
        )(hp, w2, shift.reshape(1, Cout))
        return out.reshape(N * Ho * Wo, Cout), Ho, Wo

    # stride != 1 (ResNet stage-transition blocks): fold kw into the
    # contraction (K = 3*Cp) so the 256-deep MXU stays filled.
    Ho = (H - 1) // stride + 1
    Wo = (W - 1) // stride + 1
    Hph = Ho + (2 // stride)           # rows per H-phase needed by the 3 kh taps
    Hp = stride * Hph                  # padded H extent (>= H + 2)

    hp = jnp.pad(h1_nhwc, ((0, 0), (1, Hp - H - 1), (1, 1), (0, 0)))
    xw = jnp.concatenate(
        [hp[:, :, kw:kw + (Wo - 1) * stride + 1:stride, :] for kw in range(3)],
        axis=-1)                                            # (N, Hp, Wo, 3*Cp)
    xph = jnp.stack([xw[:, p::stride] for p in range(stride)], axis=1)
    xph = xph.reshape(N, stride, Hph * Wo, 3 * Cp)
    w2f = w2.reshape(3, 3 * Cp, Cout)                       # free reshape

    M = Ho * Wo
    row_chunk = min(M, 2048)           # realistic stride-2 shapes -> one chunk
    out = pl.pallas_call(
        functools.partial(_conv3x3_strided_kernel, stride=stride, Wo=Wo,
                          row_chunk=row_chunk),
        out_shape=jax.ShapeDtypeStruct((N, M, Cout), jnp.bfloat16),
        grid=(N,),
        in_specs=[
            pl.BlockSpec((1, stride, Hph * Wo, 3 * Cp), lambda n: (n, 0, 0, 0)),
            pl.BlockSpec((3, 3 * Cp, Cout), lambda n: (0, 0, 0)),
            pl.BlockSpec((1, Cout), lambda n: (0, 0)),
        ],
        out_specs=pl.BlockSpec((1, M, Cout), lambda n: (n, 0, 0)),
        compiler_params=_compiler_params(("parallel",)),
    )(xph, w2f, shift.reshape(1, Cout))
    return out.reshape(N * M, Cout), Ho, Wo


def final_block(h2, w3, b3, xs, ws=None, bs=None, *, tm_max=512):
    """Fused conv3(1x1) + bn3 + shortcut-add + relu.  Output bf16; the f32 cast
    happens at the NCHW boundary transpose."""
    M, K = h2.shape
    Nc = w3.shape[1]
    Ks = xs.shape[1]
    tm, Mp = _row_tiling(M, tm_max)
    if Mp != M:                         # rare fallback (awkward M only)
        h2 = jnp.pad(h2, ((0, Mp - M), (0, 0)))
        xs = jnp.pad(xs, ((0, Mp - M), (0, 0)))

    if ws is not None:
        out = pl.pallas_call(
            _final_proj_kernel,
            out_shape=jax.ShapeDtypeStruct((Mp, Nc), jnp.bfloat16),
            grid=(Mp // tm,),
            in_specs=[
                pl.BlockSpec((tm, K), lambda i: (i, 0)),
                pl.BlockSpec((K, Nc), lambda i: (0, 0)),
                pl.BlockSpec((1, Nc), lambda i: (0, 0)),
                pl.BlockSpec((tm, Ks), lambda i: (i, 0)),
                pl.BlockSpec((Ks, Nc), lambda i: (0, 0)),
                pl.BlockSpec((1, Nc), lambda i: (0, 0)),
            ],
            out_specs=pl.BlockSpec((tm, Nc), lambda i: (i, 0)),
            compiler_params=_compiler_params(("parallel",)),
        )(h2, w3, b3.reshape(1, Nc), xs, ws, bs.reshape(1, Nc))
    else:
        out = pl.pallas_call(
            _final_identity_kernel,
            out_shape=jax.ShapeDtypeStruct((Mp, Nc), jnp.bfloat16),
            grid=(Mp // tm,),
            in_specs=[
                pl.BlockSpec((tm, K), lambda i: (i, 0)),
                pl.BlockSpec((K, Nc), lambda i: (0, 0)),
                pl.BlockSpec((1, Nc), lambda i: (0, 0)),
                pl.BlockSpec((tm, Ks), lambda i: (i, 0)),
            ],
            out_specs=pl.BlockSpec((tm, Nc), lambda i: (i, 0)),
            compiler_params=_compiler_params(("parallel",)),
        )(h2, w3, b3.reshape(1, Nc), xs)
    return out if Mp == M else out[:M]


# ----------------------------------------------------------------------------
# Parameter construction (mirrors Bottleneck.__init__; BN folded, lane-padded)
# ----------------------------------------------------------------------------
def make_params(key, in_planes, planes, expansion, stride):
    assert stride in (1, 2), "phase-split conv2 path derived for stride in {1,2}"
    out_planes = expansion * planes
    k1, k2, k3, k4 = jax.random.split(key, 4)
    eps = 1e-5

    def bn_fold(c):
        gamma = jnp.ones((c,), jnp.float32)   # PyTorch BN defaults (inference)
        beta = jnp.zeros((c,), jnp.float32)
        rmean = jnp.zeros((c,), jnp.float32)
        rvar = jnp.ones((c,), jnp.float32)
        scale = gamma / jnp.sqrt(rvar + eps)
        shift = beta - rmean * scale
        return scale, shift

    Cpi = _round_up(in_planes, LANE)
    Cpp = _round_up(planes, LANE)
    Cpo = _round_up(out_planes, LANE)

    p = dict(in_planes=in_planes, planes=planes, out_planes=out_planes,
             stride=stride, Cpi=Cpi, Cpp=Cpp, Cpo=Cpo)

    # reference conv weights in PyTorch OIHW layout (f32)
    p["w1_oihw"] = 0.1 * jax.random.normal(k1, (planes, in_planes, 1, 1), jnp.float32)
    p["w2_oihw"] = 0.1 * jax.random.normal(k2, (planes, planes, 3, 3), jnp.float32)
    p["w3_oihw"] = 0.1 * jax.random.normal(k3, (out_planes, planes, 1, 1), jnp.float32)
    p["s1"], p["b1"] = bn_fold(planes)
    p["s2"], p["b2"] = bn_fold(planes)
    p["s3"], p["b3"] = bn_fold(out_planes)

    # BN scale folded into weight columns; lane-padded; bf16 for the MXU.
    w1 = p["w1_oihw"][:, :, 0, 0].T * p["s1"][None, :]                # (in, planes)
    p["w1_p"] = _pad2d(w1, Cpi, Cpp).astype(jnp.bfloat16)
    p["b1_p"] = jnp.pad(p["b1"], (0, Cpp - planes))

    w2 = p["w2_oihw"] * p["s2"][:, None, None, None]                  # (co, ci, kh, kw)
    w2 = w2.transpose(2, 3, 1, 0)                                     # (kh, kw, ci, co)
    w2 = jnp.pad(w2, ((0, 0), (0, 0), (0, Cpp - planes), (0, Cpp - planes)))
    p["w2_p"] = w2.astype(jnp.bfloat16)                               # (3, 3, Cpp, Cpp)
    p["b2_p"] = jnp.pad(p["b2"], (0, Cpp - planes))

    w3 = p["w3_oihw"][:, :, 0, 0].T * p["s3"][None, :]                # (planes, out)
    p["w3_p"] = _pad2d(w3, Cpp, Cpo).astype(jnp.bfloat16)
    p["b3_p"] = jnp.pad(p["b3"], (0, Cpo - out_planes))

    p["has_proj"] = (stride != 1) or (in_planes != out_planes)
    if p["has_proj"]:
        p["ws_oihw"] = 0.1 * jax.random.normal(
            k4, (out_planes, in_planes, 1, 1), jnp.float32)
        p["ss"], p["bs"] = bn_fold(out_planes)
        ws = p["ws_oihw"][:, :, 0, 0].T * p["ss"][None, :]            # (in, out)
        p["ws_p"] = _pad2d(ws, Cpi, Cpo).astype(jnp.bfloat16)
        p["bs_p"] = jnp.pad(p["bs"], (0, Cpo - out_planes))
    return p


# ----------------------------------------------------------------------------
# Bottleneck forward (Pallas path).  Input/output NCHW f32, like PyTorch.
# ----------------------------------------------------------------------------
def bottleneck_forward(x_nchw, params):
    stride = params["stride"]
    Cpi, Cpp = params["Cpi"], params["Cpp"]
    x = jnp.transpose(x_nchw, (0, 2, 3, 1)).astype(jnp.bfloat16)      # NHWC bf16
    N, H, W, Cin = x.shape
    xp = jnp.pad(x, ((0, 0), (0, 0), (0, 0), (0, Cpi - Cin)))         # lane-pad C

    # conv1 (1x1) + bn1 + relu  -> bf16 intermediate
    h1 = matmul_bn(xp.reshape(N * H * W, Cpi), params["w1_p"], params["b1_p"],
                   relu=True, out_dtype=jnp.bfloat16)
    h1 = h1.reshape(N, H, W, Cpp)

    # conv2 (3x3, stride, pad=1) + bn2 + relu  (fused tap-accumulating kernel)
    h2, Ho, Wo = conv3x3_bn_relu(h1, params["w2_p"], params["b2_p"], stride=stride)

    # conv3 (1x1) + bn3 + shortcut + relu  (single fused kernel, bf16 out)
    if params["has_proj"]:
        # TODO(synk): strided shortcut gather still done by XLA (see header).
        xs = xp[:, ::stride, ::stride, :].reshape(N * Ho * Wo, Cpi)
        out = final_block(h2, params["w3_p"], params["b3_p"],
                          xs, params["ws_p"], params["bs_p"])
    else:
        xs = xp.reshape(N * H * W, Cpi)
        out = final_block(h2, params["w3_p"], params["b3_p"], xs)

    out = out[:, :params["out_planes"]].reshape(N, Ho, Wo, params["out_planes"])
    return jnp.transpose(out, (0, 3, 1, 2)).astype(jnp.float32)       # NCHW f32


# ----------------------------------------------------------------------------
# Pure-JAX f32 reference (lax conv) for correctness check
# ----------------------------------------------------------------------------
def bottleneck_ref(x_nchw, params):
    stride = params["stride"]

    def conv(x, w, s=1, pad=0):
        return jax.lax.conv_general_dilated(
            x, w, (s, s), [(pad, pad), (pad, pad)],
            dimension_numbers=("NCHW", "OIHW", "NCHW"))

    def bn(x, scale, shift):
        return x * scale[None, :, None, None] + shift[None, :, None, None]

    x = x_nchw.astype(jnp.float32)
    out = jax.nn.relu(bn(conv(x, params["w1_oihw"]), params["s1"], params["b1"]))
    out = jax.nn.relu(bn(conv(out, params["w2_oihw"], s=stride, pad=1),
                         params["s2"], params["b2"]))
    out = bn(conv(out, params["w3_oihw"]), params["s3"], params["b3"])
    if params["has_proj"]:
        sc = bn(conv(x, params["ws_oihw"], s=stride), params["ss"], params["bs"])
    else:
        sc = x
    return jax.nn.relu(out + sc)


# ----------------------------------------------------------------------------
if __name__ == "__main__":
    key = jax.random.PRNGKey(0)
    kx1, kp1, kx2, kp2 = jax.random.split(key, 4)

    # Config 1: projection shortcut (stride=2, in_planes != expansion*planes)
    x1 = jax.random.normal(kx1, (2, 4, 16, 16), dtype=jnp.float32)    # NCHW
    p1 = make_params(kp1, in_planes=4, planes=4, expansion=4, stride=2)
    out1 = jax.block_until_ready(bottleneck_forward(x1, p1))
    ref1 = jax.block_until_ready(bottleneck_ref(x1, p1))
    assert out1.shape == ref1.shape == (2, 16, 8, 8), out1.shape
    err1 = float(jnp.max(jnp.abs(out1 - ref1)))
    assert err1 < 5e-2, err1

    # Config 2: identity shortcut (stride=1, in_planes == expansion*planes)
    x2 = jax.random.normal(kx2, (2, 16, 16, 16), dtype=jnp.float32)   # NCHW
    p2 = make_params(kp2, in_planes=16, planes=4, expansion=4, stride=1)
    out2 = jax.block_until_ready(bottleneck_forward(x2, p2))
    ref2 = jax.block_until_ready(bottleneck_ref(x2, p2))
    assert out2.shape == ref2.shape == (2, 16, 16, 16), out2.shape
    err2 = float(jnp.max(jnp.abs(out2 - ref2)))
    assert err2 < 5e-2, err2

    print("KERNEL_OK")
</pallas_src>

<mosaic_0001>
module attributes {stable_mosaic.version = 11 : i64} {
  func.func @_matmul_bn_kernel(%arg0: i32, %arg1: memref<512x128xbf16, #tpu.memory_space<vmem>>, %arg2: memref<128x128xbf16, #tpu.memory_space<vmem>>, %arg3: memref<1x128xf32, #tpu.memory_space<vmem>>, %arg4: memref<512x128xbf16, #tpu.memory_space<vmem>>) attributes {dimension_semantics = [#tpu.dimension_semantics<parallel>], iteration_bounds = array<i64: 1>, scalar_prefetch = 0 : i64, scratch_operands = 0 : i64, tpu.core_type = #tpu.core_type<tc>, window_params = [{transform_indices = @transform_0, window_bounds = array<i64: 512, 128>}, {pipeline_mode = #tpu.pipeline_mode<synchronous>, transform_indices = @transform_1, window_bounds = array<i64: 128, 128>}, {pipeline_mode = #tpu.pipeline_mode<synchronous>, transform_indices = @transform_2, window_bounds = array<i64: 1, 128>}, {transform_indices = @transform_3, window_bounds = array<i64: 512, 128>}]} {
    %c0 = arith.constant 0 : index
    %c0_0 = arith.constant 0 : index
    %0 = vector.load %arg1[%c0, %c0_0] : memref<512x128xbf16, #tpu.memory_space<vmem>>, vector<512x128xbf16>
    %c0_1 = arith.constant 0 : index
    %c0_2 = arith.constant 0 : index
    %1 = vector.load %arg2[%c0_1, %c0_2] : memref<128x128xbf16, #tpu.memory_space<vmem>>, vector<128x128xbf16>
    %cst = arith.constant dense<0.000000e+00> : vector<512x128xf32>
    %2 = tpu.matmul %0, %1, %cst {dimension_numbers = #tpu.dot_dimension_numbers<[1], [0], [0], [1], [0, 0, 1, 1], [], []>} : vector<512x128xbf16>, vector<128x128xbf16>, vector<512x128xf32> -> vector<512x128xf32>
    %c0_3 = arith.constant 0 : index
    %c0_4 = arith.constant 0 : index
    %3 = vector.load %arg3[%c0_3, %c0_4] : memref<1x128xf32, #tpu.memory_space<vmem>>, vector<1x128xf32>
    %4 = vector.broadcast %3 : vector<1x128xf32> to vector<512x128xf32>
    %5 = arith.addf %2, %4 : vector<512x128xf32>
    %cst_5 = arith.constant 0.000000e+00 : f32
    %6 = vector.broadcast %cst_5 : f32 to vector<512x128xf32>
    %7 = arith.maximumf %5, %6 : vector<512x128xf32>
    %8 = arith.truncf %7 : vector<512x128xf32> to vector<512x128xbf16>
    %c0_6 = arith.constant 0 : index
    %c0_7 = arith.constant 0 : index
    %9 = vector.load %arg4[%c0_6, %c0_7] : memref<512x128xbf16, #tpu.memory_space<vmem>>, vector<512x128xbf16>
    tpu.vector_store %arg4[%c0_6, %c0_7], %8 {strides = array<i32>} : memref<512x128xbf16, #tpu.memory_space<vmem>>, vector<512x128xbf16>,
    return
  }
  func.func @transform_0(%arg0: i32) -> (i32, i32) {
    %c0_i32 = arith.constant 0 : i32
    %c0_i32_0 = arith.constant 0 : i32
    return %arg0, %c0_i32 : i32, i32
  }
  func.func @transform_1(%arg0: i32) -> (i32, i32) {
    %c0_i32 = arith.constant 0 : i32
    %c0_i32_0 = arith.constant 0 : i32
    %c0_i32_1 = arith.constant 0 : i32
    return %c0_i32, %c0_i32_0 : i32, i32
  }
  func.func @transform_2(%arg0: i32) -> (i32, i32) {
    %c0_i32 = arith.constant 0 : i32
    %c0_i32_0 = arith.constant 0 : i32
    %c0_i32_1 = arith.constant 0 : i32
    return %c0_i32, %c0_i32_0 : i32, i32
  }
  func.func @transform_3(%arg0: i32) -> (i32, i32) {
    %c0_i32 = arith.constant 0 : i32
    %c0_i32_0 = arith.constant 0 : i32
    return %arg0, %c0_i32 : i32, i32
  }
}

</mosaic_0001>

<bundles_post_ra>
// kernel: tpu_custom_call.1
= control target key start
LH: loop header
LB: loop body
LE: loop exit
PB: predicated region body
PF: predicated region fallthrough
CT: control target
= control target key end

     0   :  { %8 = vsyncpa [#allocation3], 0  ;;  %s1814_s0 = inlined_call_operand.hbm [shape: bf16[512,128], index: 0, kind: input, shape index: {}]   ;;  %s1815_s1 = inlined_call_operand.hbm [shape: bf16[128,128], index: 1, kind: input, shape index: {}]   ;;  %s1816_s2 = inlined_call_operand.vmem [shape: f32[1,128], index: 2, kind: input, shape index: {}]   ;;  %s1817_s3 = inlined_call_operand.hbm [shape: bf16[512,128], index: 3, kind: output, shape index: {}]  }
   0x1   :  { %9 = vsyncpa [#allocation6], 0 }
   0x2   :  { %10 = vsyncpa [#allocation4], 0  ;;  %s1675_s12 = smov [#allocation2]   ;;  %s1603_s16 = scalar_lea.hbm %s1814_s0, 4096 }
   0x3   :  { %s16_s13 = sshll.u32 %s1675_s12, 4  ;;  %p1604_p0 = scmp.ne.s32.totalorder %s1814_s0, %s1603_s16  ;;  %s17_s13 = int_to_ptr.vmem [resolvable:$true] %s16_s13 }
   0x4   :  { %p1607_p1 = scmp.lt.u32.totalorder %s1603_s16, %s1814_s0 }
   0x6   :  { %p1609_p2 = pnand %p1607_p1, %p1604_p0 }
   0x8   :  { %1612 = shalt.err (!%p1609_p2)
}
   0x9   :  { %s1613_s21 = scalar_lea.vmem %s17_s13, 4096  ;;  %p1618_p4 = scmp.lt.s32.totalorder %s17_s13, %s17_s13 }
   0xa   :  { %p1614_p3 = scmp.ne.s32.totalorder %s17_s13, %s1613_s21  ;;  %p1619_p5 = scmp.lt.s32.totalorder %s1613_s21, %s1613_s21 }
   0xc   :  { %p1620_p6 = por %p1619_p5, %p1618_p4 }
   0xe   :  { %p1621_p7 = pnand %p1620_p6, %p1614_p3 }
  0x10   :  { %1624 = shalt.err (!%p1621_p7)
}
  0x11   :  { %s1676_s22 = smov 64   ;;  %s1677_s23 = smov 4  }
  0x12   :  { %22 = dma.hbm_to_vmem [thread:$0]  %s1814_s0, 4096, %s17_s13, [#allocation3], %s1676_s22, %s1676_s22, %s1677_s23  }
  0x13   :  { %s1678_s26 = smov [#allocation5]   ;;  %s1625_s30 = scalar_lea.hbm %s1815_s1, 1024 }
  0x14   :  { %s28_s27 = sshll.u32 %s1678_s26, 4  ;;  %p1626_p8 = scmp.ne.s32.totalorder %s1815_s1, %s1625_s30  ;;  %s29_s27 = int_to_ptr.vmem [resolvable:$true] %s28_s27 }
  0x15   :  { %p1629_p9 = scmp.lt.u32.totalorder %s1625_s30, %s1815_s1 }
  0x17   :  { %p1631_p10 = pnand %p1629_p9, %p1626_p8 }
  0x19   :  { %1634 = shalt.err (!%p1631_p10)
}
  0x1a   :  { %s1635_s8 = scalar_lea.vmem %s29_s27, 1024  ;;  %p1640_p12 = scmp.lt.s32.totalorder %s29_s27, %s29_s27 }
  0x1b   :  { %p1636_p11 = scmp.ne.s32.totalorder %s29_s27, %s1635_s8  ;;  %p1641_p13 = scmp.lt.s32.totalorder %s1635_s8, %s1635_s8 }
  0x1d   :  { %p1642_p0 = por %p1641_p13, %p1640_p12 }
  0x1f   :  { %p1643_p1 = pnand %p1642_p0, %p1636_p11 }
  0x21   :  { %1646 = shalt.err (!%p1643_p1)
}
  0x22   :  { %34 = dma.hbm_to_vmem [thread:$0]  %s1815_s1, 1024, %s29_s27, [#allocation6], %s1676_s22, %s1676_s22, %s1677_s23  }
  0x23   :  { %1669 = dma.done.wait [#allocation3], 4096  }
  0x24   :  { %1670 = vsyncadd [#allocation3], 4294963200 }
  0x25   :  { %1671 = dma.done.wait [#allocation6], 1024  }
  0x26   :  { %1672 = vsyncadd [#allocation6], 4294966272  ;;  %v1563_v0 = vld [vmem:[#allocation5] sm:$0xff]   ;;  %v1564_v1 = vld [vmem:[#allocation5 + $0x8] sm:$0xff]  }
  0x27   :  { %1462 = vmatprep.subr.bf16.mxu0 %v1563_v0  ;;  %1542 = vmatprep.subr.bf16.mxu1 %v1563_v0  ;;  %v1565_v2 = vld [vmem:[#allocation5 + $0x10] sm:$0xff]   ;;  %v1566_v3 = vld [vmem:[#allocation5 + $0x18] sm:$0xff]   ;;  %v1571_v4 = vld [vmem:[#allocation2] sm:$0xff]  }
  0x28   :  { %1463 = vmatpush3.bf16.msra.mxu0 %v1563_v0  ;;  %1550 = vmatpush3.bf16.msra.mxu1 %v1563_v0  ;;  %v1572_v5 = vld [vmem:[#allocation2 + $0x80] sm:$0xff]   ;;  %v1568_v7 = vld [vmem:[#allocation5 + $0x28] sm:$0xff]   ;;  %v1569_v8 = vld [vmem:[#allocation5 + $0x30] sm:$0xff]  }
  0x29   :  { %1464 = vmatprep.subr.bf16.mxu0 %v1564_v1  ;;  %1543 = vmatprep.subr.bf16.mxu1 %v1564_v1  ;;  %v1567_v6 = vld [vmem:[#allocation5 + $0x20] sm:$0xff]   ;;  %v1570_v9 = vld [vmem:[#allocation5 + $0x38] sm:$0xff]   ;;  %v1573_v10 = vld [vmem:[#allocation2 + $0x8] sm:$0xff]  }
  0x2a   :  { %1478 = vmatprep.mubr.bf16.mxu0 %v1571_v4  ;;  %1510 = vmatprep.mubr.bf16.mxu1 %v1572_v5  ;;  %v1574_v11 = vld [vmem:[#allocation2 + $0x88] sm:$0xff]   ;;  %v1575_v12 = vld [vmem:[#allocation2 + $0x10] sm:$0xff]   ;;  %v1577_v14 = vld [vmem:[#allocation2 + $0x18] sm:$0xff]  }
  0x2b   :  { %v1576_v13 = vld [vmem:[#allocation2 + $0x90] sm:$0xff]   ;;  %v1578_v15 = vld [vmem:[#allocation2 + $0x98] sm:$0xff]   ;;  %v1579_v16 = vld [vmem:[#allocation2 + $0x20] sm:$0xff]  }
  0x2c   :  { %1465 = vmatpush3.bf16.msra.mxu0 %v1564_v1  ;;  %1551 = vmatpush3.bf16.msra.mxu1 %v1564_v1  ;;  %v1580_v17 = vld [vmem:[#allocation2 + $0xa0] sm:$0xff]   ;;  %v1581_v18 = vld [vmem:[#allocation2 + $0x28] sm:$0xff]   ;;  %v1583_v20 = vld [vmem:[#allocation2 + $0x30] sm:$0xff]  }
  0x2d   :  { %1466 = vmatprep.subr.bf16.mxu0 %v1565_v2  ;;  %1544 = vmatprep.subr.bf16.mxu1 %v1565_v2  ;;  %v1582_v19 = vld [vmem:[#allocation2 + $0xa8] sm:$0xff]   ;;  %v1584_v21 = vld [vmem:[#allocation2 + $0xb0] sm:$0xff]   ;;  %v1585_v22 = vld [vmem:[#allocation2 + $0x38] sm:$0xff]  }
  0x2e   :  { %v1586_v23 = vld [vmem:[#allocation2 + $0xb8] sm:$0xff]   ;;  %v1587_v24 = vld [vmem:[#allocation2 + $0x40] sm:$0xff]   ;;  %v1589_v26 = vld [vmem:[#allocation2 + $0x48] sm:$0xff]  }
  0x2f   :  { %v1588_v25 = vld [vmem:[#allocation2 + $0xc0] sm:$0xff]   ;;  %v1590_v27 = vld [vmem:[#allocation2 + $0xc8] sm:$0xff]   ;;  %v1591_v28 = vld [vmem:[#allocation2 + $0x50] sm:$0xff]  }
  0x30   :  { %1467 = vmatpush3.bf16.msra.mxu0 %v1565_v2  ;;  %1552 = vmatpush3.bf16.msra.mxu1 %v1565_v2  ;;  %v1592_v29 = vld [vmem:[#allocation2 + $0xd0] sm:$0xff]   ;;  %v1593_v30 = vld [vmem:[#allocation2 + $0x58] sm:$0xff]   ;;  %v1595_v32 = vld [vmem:[#allocation2 + $0x60] sm:$0xff]  }
  0x31   :  { %1468 = vmatprep.subr.bf16.mxu0 %v1566_v3  ;;  %1545 = vmatprep.subr.bf16.mxu1 %v1566_v3  ;;  %v1594_v31 = vld [vmem:[#allocation2 + $0xd8] sm:$0xff]   ;;  %v1596_v33 = vld [vmem:[#allocation2 + $0xe0] sm:$0xff]   ;;  %v1597_v34 = vld [vmem:[#allocation2 + $0x68] sm:$0xff]  }
  0x32   :  { %v1598_v35 = vld [vmem:[#allocation2 + $0xe8] sm:$0xff]   ;;  %v1599_v36 = vld [vmem:[#allocation2 + $0x70] sm:$0xff]   ;;  %v1601_v38 = vld [vmem:[#allocation2 + $0x78] sm:$0xff]  }
  0x33   :  { %v1600_v37 = vld [vmem:[#allocation2 + $0xf0] sm:$0xff]   ;;  %v1602_v39 = vld [vmem:[#allocation2 + $0xf8] sm:$0xff]   ;;  %v1733_v40 = vld [vmem:[%s1816_s2] ss:$0 sm:$0xff]  ;;  %s1679_s2 = smov [#allocation7]  }
  0x34   :  { %1469 = vmatpush3.bf16.msra.mxu0 %v1566_v3  ;;  %1553 = vmatpush3.bf16.msra.mxu1 %v1566_v3  ;;  %s1049_s11 = sshll.u32 %s1679_s2, 4  ;;  %s1050_s11 = int_to_ptr.vmem [resolvable:$true] %s1049_s11 }
  0x35   :  { %1470 = vmatprep.subr.bf16.mxu0 %v1567_v6  ;;  %1546 = vmatprep.subr.bf16.mxu1 %v1567_v6  ;;  %s1647_s12 = scalar_lea.vmem %s1050_s11, 4096  ;;  %p1652_p3 = scmp.lt.s32.totalorder %s1050_s11, %s1050_s11 }
  0x36   :  { %p1648_p2 = scmp.ne.s32.totalorder %s1050_s11, %s1647_s12  ;;  %p1653_p4 = scmp.lt.s32.totalorder %s1647_s12, %s1647_s12 }
  0x38   :  { %1471 = vmatpush3.bf16.msra.mxu0 %v1567_v6  ;;  %1554 = vmatpush3.bf16.msra.mxu1 %v1567_v6  ;;  %p1654_p5 = por %p1653_p4, %p1652_p3 }
  0x39   :  { %1472 = vmatprep.subr.bf16.mxu0 %v1568_v7  ;;  %1547 = vmatprep.subr.bf16.mxu1 %v1568_v7 }
  0x3a   :  { %p1655_p6 = pnand %p1654_p5, %p1648_p2 }
  0x3c   :  { %1473 = vmatpush3.bf16.msra.mxu0 %v1568_v7  ;;  %1555 = vmatpush3.bf16.msra.mxu1 %v1568_v7 }
  0x3d   :  { %1474 = vmatprep.subr.bf16.mxu0 %v1569_v8  ;;  %1548 = vmatprep.subr.bf16.mxu1 %v1569_v8 }
  0x40   :  { %1475 = vmatpush3.bf16.msra.mxu0 %v1569_v8  ;;  %1556 = vmatpush3.bf16.msra.mxu1 %v1569_v8 }
  0x41   :  { %1476 = vmatprep.subr.bf16.mxu0 %v1570_v9  ;;  %1549 = vmatprep.subr.bf16.mxu1 %v1570_v9 }
  0x44   :  { %1477 = vmatpush3.bf16.msra.mxu0 %v1570_v9  ;;  %1557 = vmatpush3.bf16.msra.mxu1 %v1570_v9 }
  0x47   :  { %1479 = vmatmul.mubr.bf16.vlgmr.msra.gmra.mrb[0].mxu0 %v1573_v10  ;;  %1511 = vmatmul.mubr.bf16.vlgmr.msra.gmra.mrb[0].mxu1 %v1574_v11 }
  0x48   :  { %1482 = vmatprep.mubr.bf16.mxu0 %v1575_v12  ;;  %1514 = vmatprep.mubr.bf16.mxu1 %v1576_v13 }
  0x4f   :  { %1483 = vmatmul.mubr.bf16.gmra.mrb[4].mxu0 %v1577_v14  ;;  %1515 = vmatmul.mubr.bf16.gmra.mrb[4].mxu1 %v1578_v15 }
  0x50   :  { %1486 = vmatprep.mubr.bf16.mxu0 %v1579_v16  ;;  %1518 = vmatprep.mubr.bf16.mxu1 %v1580_v17 }
  0x57   :  { %1487 = vmatmul.mubr.bf16.gmra.mrb[8].mxu0 %v1581_v18  ;;  %1519 = vmatmul.mubr.bf16.gmra.mrb[8].mxu1 %v1582_v19 }
  0x58   :  { %1490 = vmatprep.mubr.bf16.mxu0 %v1583_v20  ;;  %1522 = vmatprep.mubr.bf16.mxu1 %v1584_v21 }
  0x5f   :  { %1491 = vmatmul.mubr.bf16.gmra.mrb[12].mxu0 %v1585_v22  ;;  %1523 = vmatmul.mubr.bf16.gmra.mrb[12].mxu1 %v1586_v23 }
  0x60   :  { %1494 = vmatprep.mubr.bf16.mxu0 %v1587_v24  ;;  %1526 = vmatprep.mubr.bf16.mxu1 %v1588_v25 }
  0x67   :  { %1495 = vmatmul.mubr.bf16.gmra.mrb[16].mxu0 %v1589_v26  ;;  %1527 = vmatmul.mubr.bf16.gmra.mrb[16].mxu1 %v1590_v27 }
  0x68   :  { %1498 = vmatprep.mubr.bf16.mxu0 %v1591_v28  ;;  %1530 = vmatprep.mubr.bf16.mxu1 %v1592_v29 }
  0x6f   :  { %1499 = vmatmul.mubr.bf16.gmra.mrb[20].mxu0 %v1593_v30  ;;  %1531 = vmatmul.mubr.bf16.gmra.mrb[20].mxu1 %v1594_v31 }
  0x70   :  { %1502 = vmatprep.mubr.bf16.mxu0 %v1595_v32  ;;  %1534 = vmatprep.mubr.bf16.mxu1 %v1596_v33 }
  0x77   :  { %1503 = vmatmul.mubr.bf16.gmra.mrb[24].mxu0 %v1597_v34  ;;  %1535 = vmatmul.mubr.bf16.gmra.mrb[24].mxu1 %v1598_v35 }
  0x78   :  { %1506 = vmatprep.mubr.bf16.mxu0 %v1599_v36  ;;  %1538 = vmatprep.mubr.bf16.mxu1 %v1600_v37 }
  0x7f   :  { %1507 = vmatmul.mubr.bf16.gmra.mrb[28].mxu0 %v1601_v38  ;;  %1539 = vmatmul.mubr.bf16.gmra.mrb[28].mxu1 %v1602_v39 }
 0x11a   :  { %v1480_v41 = vpop.f32.mrb[0].mxu0  ;;  %v1512_v42 = vpop.f32.mrb[0].mxu1 }
 0x11b   :  { %v414_v43 = vadd.f32 %v1480_v41, %v1733_v40  ;;  %v542_v44 = vadd.f32 %v1512_v42, %v1733_v40  ;;  %v405_v45 = vpop.f32.mrb[1].mxu0  ;;  %v533_v46 = vpop.f32.mrb[1].mxu1 }
 0x11c   :  { %v406_v47 = vadd.f32 %v1733_v40, %v405_v45  ;;  %v534_v48 = vadd.f32 %v1733_v40, %v533_v46  ;;  %v1481_v49 = vpop.f32.mrb[2].mxu0  ;;  %v1513_v50 = vpop.f32.mrb[2].mxu1 }
 0x11d   :  { %v417_v51 = vadd.f32 %v1481_v49, %v1733_v40  ;;  %v545_v52 = vadd.f32 %v1513_v50, %v1733_v40  ;;  %v408_v53 = vpop.f32.mrb[3].mxu0  ;;  %v536_v54 = vpop.f32.mrb[3].mxu1  ;;  %v662_v57 = vmax.f32 %v414_v43, 0.0  ;;  %v694_v58 = vmax.f32 %v542_v44, 0.0 }
 0x11e   :  { %v409_v55 = vadd.f32 %v1733_v40, %v408_v53  ;;  %v537_v56 = vadd.f32 %v1733_v40, %v536_v54  ;;  %v660_v61 = vmax.f32 %v406_v47, 0.0  ;;  %v692_v62 = vmax.f32 %v534_v48, 0.0 }
 0x11f   :  { %v663_v59 = vmax.f32 %v417_v51, 0.0  ;;  %v695_v60 = vmax.f32 %v545_v52, 0.0 }
 0x120   :  { %v661_v63 = vmax.f32 %v409_v55, 0.0  ;;  %v693_v0 = vmax.f32 %v537_v56, 0.0 }
 0x121   :  { %v1239_v1 = vpack.c.bf16 %v663_v59, %v662_v57  ;;  %v1319_v2 = vpack.c.bf16 %v695_v60, %v694_v58 }
 0x122   :  { %v1234_v3 = vpack.c.bf16 %v661_v63, %v660_v61  ;;  %v1314_v4 = vpack.c.bf16 %v693_v0, %v692_v62  ;;  %v1484_v5 = vpop.f32.mrb[4].mxu0  ;;  %v1516_v6 = vpop.f32.mrb[4].mxu1 }
 0x123   :  { %1391 = vst [vmem:[#allocation7 + $0x8] sm:$0xff] %v1239_v1   ;;  %1407 = vst [vmem:[#allocation7 + $0x88] sm:$0xff] %v1319_v2   ;;  %v430_v7 = vadd.f32 %v1484_v5, %v1733_v40  ;;  %v558_v8 = vadd.f32 %v1516_v6, %v1733_v40  ;;  %v421_v9 = vpop.f32.mrb[5].mxu0  ;;  %v549_v10 = vpop.f32.mrb[5].mxu1 }
 0x124   :  { %1235 = vst [vmem:[#allocation7] sm:$0xff] %v1234_v3   ;;  %1406 = vst [vmem:[#allocation7 + $0x80] sm:$0xff] %v1314_v4   ;;  %v422_v11 = vadd.f32 %v1733_v40, %v421_v9  ;;  %v550_v12 = vadd.f32 %v1733_v40, %v549_v10  ;;  %v1485_v13 = vpop.f32.mrb[6].mxu0  ;;  %v1517_v14 = vpop.f32.mrb[6].mxu1 }
 0x125   :  { %v433_v15 = vadd.f32 %v1485_v13, %v1733_v40  ;;  %v561_v16 = vadd.f32 %v1517_v14, %v1733_v40  ;;  %v424_v17 = vpop.f32.mrb[7].mxu0  ;;  %v552_v18 = vpop.f32.mrb[7].mxu1  ;;  %v666_v21 = vmax.f32 %v430_v7, 0.0  ;;  %v698_v22 = vmax.f32 %v558_v8, 0.0 }
 0x126   :  { %v425_v19 = vadd.f32 %v1733_v40, %v424_v17  ;;  %v553_v20 = vadd.f32 %v1733_v40, %v552_v18  ;;  %v664_v25 = vmax.f32 %v422_v11, 0.0  ;;  %v696_v26 = vmax.f32 %v550_v12, 0.0 }
 0x127   :  { %v667_v23 = vmax.f32 %v433_v15, 0.0  ;;  %v699_v24 = vmax.f32 %v561_v16, 0.0 }
 0x128   :  { %v665_v27 = vmax.f32 %v425_v19, 0.0  ;;  %v697_v28 = vmax.f32 %v553_v20, 0.0 }
 0x129   :  { %v1249_v29 = vpack.c.bf16 %v667_v23, %v666_v21  ;;  %v1329_v30 = vpack.c.bf16 %v699_v24, %v698_v22 }
 0x12a   :  { %v1244_v31 = vpack.c.bf16 %v665_v27, %v664_v25  ;;  %v1324_v32 = vpack.c.bf16 %v697_v28, %v696_v26  ;;  %v1488_v33 = vpop.f32.mrb[8].mxu0  ;;  %v1520_v34 = vpop.f32.mrb[8].mxu1 }
 0x12b   :  { %1393 = vst [vmem:[#allocation7 + $0x18] sm:$0xff] %v1249_v29   ;;  %1409 = vst [vmem:[#allocation7 + $0x98] sm:$0xff] %v1329_v30   ;;  %v446_v35 = vadd.f32 %v1488_v33, %v1733_v40  ;;  %v574_v36 = vadd.f32 %v1520_v34, %v1733_v40  ;;  %v437_v37 = vpop.f32.mrb[9].mxu0  ;;  %v565_v38 = vpop.f32.mrb[9].mxu1 }
 0x12c   :  { %1392 = vst [vmem:[#allocation7 + $0x10] sm:$0xff] %v1244_v31   ;;  %1408 = vst [vmem:[#allocation7 + $0x90] sm:$0xff] %v1324_v32   ;;  %v438_v39 = vadd.f32 %v1733_v40, %v437_v37  ;;  %v566_v41 = vadd.f32 %v1733_v40, %v565_v38  ;;  %v1489_v42 = vpop.f32.mrb[10].mxu0  ;;  %v1521_v43 = vpop.f32.mrb[10].mxu1 }
 0x12d   :  { %v449_v44 = vadd.f32 %v1489_v42, %v1733_v40  ;;  %v577_v45 = vadd.f32 %v1521_v43, %v1733_v40  ;;  %v440_v46 = vpop.f32.mrb[11].mxu0  ;;  %v568_v47 = vpop.f32.mrb[11].mxu1  ;;  %v670_v50 = vmax.f32 %v446_v35, 0.0  ;;  %v702_v51 = vmax.f32 %v574_v36, 0.0 }
 0x12e   :  { %v441_v48 = vadd.f32 %v1733_v40, %v440_v46  ;;  %v569_v49 = vadd.f32 %v1733_v40, %v568_v47  ;;  %v668_v54 = vmax.f32 %v438_v39, 0.0  ;;  %v700_v55 = vmax.f32 %v566_v41, 0.0 }
 0x12f   :  { %v671_v52 = vmax.f32 %v449_v44, 0.0  ;;  %v703_v53 = vmax.f32 %v577_v45, 0.0 }
 0x130   :  { %v669_v56 = vmax.f32 %v441_v48, 0.0  ;;  %v701_v57 = vmax.f32 %v569_v49, 0.0 }
 0x131   :  { %v1259_v58 = vpack.c.bf16 %v671_v52, %v670_v50  ;;  %v1339_v59 = vpack.c.bf16 %v703_v53, %v702_v51 }
 0x132   :  { %v1254_v60 = vpack.c.bf16 %v669_v56, %v668_v54  ;;  %v1334_v61 = vpack.c.bf16 %v701_v57, %v700_v55  ;;  %v1492_v62 = vpop.f32.mrb[12].mxu0  ;;  %v1524_v63 = vpop.f32.mrb[12].mxu1 }
 0x133   :  { %1395 = vst [vmem:[#allocation7 + $0x28] sm:$0xff] %v1259_v58   ;;  %1411 = vst [vmem:[#allocation7 + $0xa8] sm:$0xff] %v1339_v59   ;;  %v462_v0 = vadd.f32 %v1492_v62, %v1733_v40  ;;  %v590_v1 = vadd.f32 %v1524_v63, %v1733_v40  ;;  %v453_v2 = vpop.f32.mrb[13].mxu0  ;;  %v581_v3 = vpop.f32.mrb[13].mxu1 }
 0x134   :  { %1394 = vst [vmem:[#allocation7 + $0x20] sm:$0xff] %v1254_v60   ;;  %1410 = vst [vmem:[#allocation7 + $0xa0] sm:$0xff] %v1334_v61   ;;  %v454_v4 = vadd.f32 %v1733_v40, %v453_v2  ;;  %v582_v5 = vadd.f32 %v1733_v40, %v581_v3  ;;  %v1493_v6 = vpop.f32.mrb[14].mxu0  ;;  %v1525_v7 = vpop.f32.mrb[14].mxu1 }
 0x135   :  { %v465_v8 = vadd.f32 %v1493_v6, %v1733_v40  ;;  %v593_v9 = vadd.f32 %v1525_v7, %v1733_v40  ;;  %v456_v10 = vpop.f32.mrb[15].mxu0  ;;  %v584_v11 = vpop.f32.mrb[15].mxu1  ;;  %v674_v14 = vmax.f32 %v462_v0, 0.0  ;;  %v706_v15 = vmax.f32 %v590_v1, 0.0 }
 0x136   :  { %v457_v12 = vadd.f32 %v1733_v40, %v456_v10  ;;  %v585_v13 = vadd.f32 %v1733_v40, %v584_v11  ;;  %v672_v18 = vmax.f32 %v454_v4, 0.0  ;;  %v704_v19 = vmax.f32 %v582_v5, 0.0 }
 0x137   :  { %v675_v16 = vmax.f32 %v465_v8, 0.0  ;;  %v707_v17 = vmax.f32 %v593_v9, 0.0 }
 0x138   :  { %v673_v20 = vmax.f32 %v457_v12, 0.0  ;;  %v705_v21 = vmax.f32 %v585_v13, 0.0 }
 0x139   :  { %v1269_v22 = vpack.c.bf16 %v675_v16, %v674_v14  ;;  %v1349_v23 = vpack.c.bf16 %v707_v17, %v706_v15 }
 0x13a   :  { %v1264_v24 = vpack.c.bf16 %v673_v20, %v672_v18  ;;  %v1344_v25 = vpack.c.bf16 %v705_v21, %v704_v19  ;;  %v1496_v26 = vpop.f32.mrb[16].mxu0  ;;  %v1528_v27 = vpop.f32.mrb[16].mxu1 }
 0x13b   :  { %1397 = vst [vmem:[#allocation7 + $0x38] sm:$0xff] %v1269_v22   ;;  %1413 = vst [vmem:[#allocation7 + $0xb8] sm:$0xff] %v1349_v23   ;;  %v478_v28 = vadd.f32 %v1496_v26, %v1733_v40  ;;  %v606_v29 = vadd.f32 %v1528_v27, %v1733_v40  ;;  %v469_v30 = vpop.f32.mrb[17].mxu0  ;;  %v597_v31 = vpop.f32.mrb[17].mxu1 }
 0x13c   :  { %1396 = vst [vmem:[#allocation7 + $0x30] sm:$0xff] %v1264_v24   ;;  %1412 = vst [vmem:[#allocation7 + $0xb0] sm:$0xff] %v1344_v25   ;;  %v470_v32 = vadd.f32 %v1733_v40, %v469_v30  ;;  %v598_v33 = vadd.f32 %v1733_v40, %v597_v31  ;;  %v1497_v34 = vpop.f32.mrb[18].mxu0  ;;  %v1529_v35 = vpop.f32.mrb[18].mxu1 }
 0x13d   :  { %v481_v36 = vadd.f32 %v1497_v34, %v1733_v40  ;;  %v609_v37 = vadd.f32 %v1529_v35, %v1733_v40  ;;  %v472_v38 = vpop.f32.mrb[19].mxu0  ;;  %v600_v39 = vpop.f32.mrb[19].mxu1  ;;  %v678_v43 = vmax.f32 %v478_v28, 0.0  ;;  %v710_v44 = vmax.f32 %v606_v29, 0.0 }
 0x13e   :  { %v473_v41 = vadd.f32 %v1733_v40, %v472_v38  ;;  %v601_v42 = vadd.f32 %v1733_v40, %v600_v39  ;;  %v676_v47 = vmax.f32 %v470_v32, 0.0  ;;  %v708_v48 = vmax.f32 %v598_v33, 0.0 }
 0x13f   :  { %v679_v45 = vmax.f32 %v481_v36, 0.0  ;;  %v711_v46 = vmax.f32 %v609_v37, 0.0 }
 0x140   :  { %v677_v49 = vmax.f32 %v473_v41, 0.0  ;;  %v709_v50 = vmax.f32 %v601_v42, 0.0 }
 0x141   :  { %v1279_v51 = vpack.c.bf16 %v679_v45, %v678_v43  ;;  %v1359_v52 = vpack.c.bf16 %v711_v46, %v710_v44 }
 0x142   :  { %v1274_v53 = vpack.c.bf16 %v677_v49, %v676_v47  ;;  %v1354_v54 = vpack.c.bf16 %v709_v50, %v708_v48  ;;  %v1500_v55 = vpop.f32.mrb[20].mxu0  ;;  %v1532_v56 = vpop.f32.mrb[20].mxu1 }
 0x143   :  { %1399 = vst [vmem:[#allocation7 + $0x48] sm:$0xff] %v1279_v51   ;;  %1415 = vst [vmem:[#allocation7 + $0xc8] sm:$0xff] %v1359_v52   ;;  %v494_v57 = vadd.f32 %v1500_v55, %v1733_v40  ;;  %v622_v58 = vadd.f32 %v1532_v56, %v1733_v40  ;;  %v485_v59 = vpop.f32.mrb[21].mxu0  ;;  %v613_v60 = vpop.f32.mrb[21].mxu1 }
 0x144   :  { %1398 = vst [vmem:[#allocation7 + $0x40] sm:$0xff] %v1274_v53   ;;  %1414 = vst [vmem:[#allocation7 + $0xc0] sm:$0xff] %v1354_v54   ;;  %v486_v61 = vadd.f32 %v1733_v40, %v485_v59  ;;  %v614_v62 = vadd.f32 %v1733_v40, %v613_v60  ;;  %v1501_v63 = vpop.f32.mrb[22].mxu0  ;;  %v1533_v0 = vpop.f32.mrb[22].mxu1 }
 0x145   :  { %v497_v1 = vadd.f32 %v1501_v63, %v1733_v40  ;;  %v625_v2 = vadd.f32 %v1533_v0, %v1733_v40  ;;  %v488_v3 = vpop.f32.mrb[23].mxu0  ;;  %v616_v4 = vpop.f32.mrb[23].mxu1  ;;  %v682_v7 = vmax.f32 %v494_v57, 0.0  ;;  %v714_v8 = vmax.f32 %v622_v58, 0.0 }
 0x146   :  { %v489_v5 = vadd.f32 %v1733_v40, %v488_v3  ;;  %v617_v6 = vadd.f32 %v1733_v40, %v616_v4  ;;  %v680_v11 = vmax.f32 %v486_v61, 0.0  ;;  %v712_v12 = vmax.f32 %v614_v62, 0.0 }
 0x147   :  { %v683_v9 = vmax.f32 %v497_v1, 0.0  ;;  %v715_v10 = vmax.f32 %v625_v2, 0.0 }
 0x148   :  { %v681_v13 = vmax.f32 %v489_v5, 0.0  ;;  %v713_v14 = vmax.f32 %v617_v6, 0.0 }
 0x149   :  { %v1289_v15 = vpack.c.bf16 %v683_v9, %v682_v7  ;;  %v1369_v16 = vpack.c.bf16 %v715_v10, %v714_v8 }
 0x14a   :  { %v1284_v17 = vpack.c.bf16 %v681_v13, %v680_v11  ;;  %v1364_v18 = vpack.c.bf16 %v713_v14, %v712_v12  ;;  %v1504_v19 = vpop.f32.mrb[24].mxu0  ;;  %v1536_v20 = vpop.f32.mrb[24].mxu1 }
 0x14b   :  { %1401 = vst [vmem:[#allocation7 + $0x58] sm:$0xff] %v1289_v15   ;;  %1417 = vst [vmem:[#allocation7 + $0xd8] sm:$0xff] %v1369_v16   ;;  %v510_v21 = vadd.f32 %v1504_v19, %v1733_v40  ;;  %v638_v22 = vadd.f32 %v1536_v20, %v1733_v40  ;;  %v501_v23 = vpop.f32.mrb[25].mxu0  ;;  %v629_v24 = vpop.f32.mrb[25].mxu1 }
 0x14c   :  { %1400 = vst [vmem:[#allocation7 + $0x50] sm:$0xff] %v1284_v17   ;;  %1416 = vst [vmem:[#allocation7 + $0xd0] sm:$0xff] %v1364_v18   ;;  %v502_v25 = vadd.f32 %v1733_v40, %v501_v23  ;;  %v630_v26 = vadd.f32 %v1733_v40, %v629_v24  ;;  %v1505_v27 = vpop.f32.mrb[26].mxu0  ;;  %v1537_v28 = vpop.f32.mrb[26].mxu1 }
 0x14d   :  { %v513_v29 = vadd.f32 %v1505_v27, %v1733_v40  ;;  %v641_v30 = vadd.f32 %v1537_v28, %v1733_v40  ;;  %v504_v31 = vpop.f32.mrb[27].mxu0  ;;  %v632_v32 = vpop.f32.mrb[27].mxu1  ;;  %v686_v35 = vmax.f32 %v510_v21, 0.0  ;;  %v718_v36 = vmax.f32 %v638_v22, 0.0 }
 0x14e   :  { %v505_v33 = vadd.f32 %v1733_v40, %v504_v31  ;;  %v633_v34 = vadd.f32 %v1733_v40, %v632_v32  ;;  %v684_v39 = vmax.f32 %v502_v25, 0.0  ;;  %v716_v41 = vmax.f32 %v630_v26, 0.0 }
 0x14f   :  { %v687_v37 = vmax.f32 %v513_v29, 0.0  ;;  %v719_v38 = vmax.f32 %v641_v30, 0.0 }
 0x150   :  { %v685_v42 = vmax.f32 %v505_v33, 0.0  ;;  %v717_v43 = vmax.f32 %v633_v34, 0.0 }
 0x151   :  { %v1299_v44 = vpack.c.bf16 %v687_v37, %v686_v35  ;;  %v1379_v45 = vpack.c.bf16 %v719_v38, %v718_v36 }
 0x152   :  { %v1294_v46 = vpack.c.bf16 %v685_v42, %v684_v39  ;;  %v1374_v47 = vpack.c.bf16 %v717_v43, %v716_v41  ;;  %v1508_v48 = vpop.f32.mrb[28].mxu0  ;;  %v1540_v49 = vpop.f32.mrb[28].mxu1 }
 0x153   :  { %1403 = vst [vmem:[#allocation7 + $0x68] sm:$0xff] %v1299_v44   ;;  %1419 = vst [vmem:[#allocation7 + $0xe8] sm:$0xff] %v1379_v45   ;;  %v526_v50 = vadd.f32 %v1508_v48, %v1733_v40  ;;  %v654_v51 = vadd.f32 %v1540_v49, %v1733_v40  ;;  %v517_v52 = vpop.f32.mrb[29].mxu0  ;;  %v645_v53 = vpop.f32.mrb[29].mxu1 }
 0x154   :  { %1402 = vst [vmem:[#allocation7 + $0x60] sm:$0xff] %v1294_v46   ;;  %1418 = vst [vmem:[#allocation7 + $0xe0] sm:$0xff] %v1374_v47   ;;  %v518_v54 = vadd.f32 %v1733_v40, %v517_v52  ;;  %v646_v55 = vadd.f32 %v1733_v40, %v645_v53  ;;  %v1509_v56 = vpop.f32.mrb[30].mxu0  ;;  %v1541_v57 = vpop.f32.mrb[30].mxu1 }
 0x155   :  { %v529_v58 = vadd.f32 %v1509_v56, %v1733_v40  ;;  %v657_v59 = vadd.f32 %v1541_v57, %v1733_v40  ;;  %v520_v60 = vpop.f32.mrb[31].mxu0  ;;  %v648_v61 = vpop.f32.mrb[31].mxu1  ;;  %v690_v0 = vmax.f32 %v526_v50, 0.0  ;;  %v722_v1 = vmax.f32 %v654_v51, 0.0 }
 0x156   :  { %v521_v62 = vadd.f32 %v1733_v40, %v520_v60  ;;  %v649_v63 = vadd.f32 %v1733_v40, %v648_v61  ;;  %v688_v4 = vmax.f32 %v518_v54, 0.0  ;;  %v720_v5 = vmax.f32 %v646_v55, 0.0 }
 0x157   :  { %v691_v2 = vmax.f32 %v529_v58, 0.0  ;;  %v723_v3 = vmax.f32 %v657_v59, 0.0 }
 0x158   :  { %v689_v6 = vmax.f32 %v521_v62, 0.0  ;;  %v721_v7 = vmax.f32 %v649_v63, 0.0 }
 0x159   :  { %v1309_v8 = vpack.c.bf16 %v691_v2, %v690_v0  ;;  %v1389_v9 = vpack.c.bf16 %v723_v3, %v722_v1 }
 0x15a   :  { %v1304_v10 = vpack.c.bf16 %v689_v6, %v688_v4  ;;  %v1384_v11 = vpack.c.bf16 %v721_v7, %v720_v5 }
 0x15b   :  { %1405 = vst [vmem:[#allocation7 + $0x78] sm:$0xff] %v1309_v8   ;;  %1421 = vst [vmem:[#allocation7 + $0xf8] sm:$0xff] %v1389_v9  }
 0x15c   :  { %1404 = vst [vmem:[#allocation7 + $0x70] sm:$0xff] %v1304_v10   ;;  %1420 = vst [vmem:[#allocation7 + $0xf0] sm:$0xff] %v1384_v11  }
 0x15d   :  { %1658 = shalt.err (!%p1655_p6)
}
 0x15e   :  { %s1659_s15 = scalar_lea.hbm %s1817_s3, 4096 }
 0x15f   :  { %p1660_p7 = scmp.ne.s32.totalorder %s1817_s3, %s1659_s15  ;;  %p1663_p8 = scmp.lt.u32.totalorder %s1659_s15, %s1817_s3 }
 0x161   :  { %p1665_p9 = pnand %p1663_p8, %p1660_p7 }
 0x163   :  { %1668 = shalt.err (!%p1665_p9)
}
 0x164   :  { %1055 = dma.vmem_to_hbm [thread:$0]  %s1050_s11, 4096, %s1817_s3, [#allocation4], %s1676_s22, %s1676_s22, %s1677_s23  }
 0x165   :  { %1673 = dma.done.wait [#allocation4], 4096  }
 0x166   :  { %1674 = vsyncadd [#allocation4], 4294963200 }
 0x167   :  { %1059 = vsyncpa [#allocation3], 1 }
 0x168   :  { %1060 = vsyncpa [#allocation6], 1 }
 0x169   :  { %1061 = vsyncpa [#allocation4], 1 }

</bundles_post_ra>
